<compile_context>
chip_gen: v6e
topology: v6e:2x2x1
jax: 0.10.0
libtpu: 0.0.40
codegen_flags: <defaults>
</compile_context>

<pallas_src>
import functools

import jax
import jax.numpy as jnp
from jax import lax
from jax.experimental import pallas as pl
from jax.experimental.pallas import tpu as pltpu


def _make_lstm_kernel(T, t_chunk, TB, H, O, unroll):
    """Builds the kernel with static shape parameters closed over."""
    needs_mask = (T % t_chunk) != 0
    unroll_eff = max(1, min(unroll, t_chunk))
    n_full = t_chunk // unroll_eff
    rem = t_chunk % unroll_eff

    def kernel(xp_ref, whh_ref, fcw_ref, fcb_ref, out_ref, h_scr, c_scr):
        # xp_ref : (t_chunk, TB, 4H) f32   hoisted x @ W_ih^T + (b_ih + b_hh)
        # whh_ref: (H, 4H)                 recurrent weight (f32 or bf16 MXU operand)
        # fcw_ref: (O, H) f32 VMEM,  fcb_ref: (O,) f32 SMEM
        # out_ref: (TB, O)
        # h_scr, c_scr: (TB, H) f32 scratch, persistent across the time grid axis.
        g = pl.program_id(1)

        @pl.when(g == 0)
        def _init():
            h_scr[...] = jnp.zeros_like(h_scr)
            c_scr[...] = jnp.zeros_like(c_scr)

        # Lane constants for the single-sigmoid gate trick (computed once per
        # kernel invocation, outside the time loops):
        #   tanh(x) = 2 * sigmoid(2x) - 1, applied only on g-gate lanes [2H, 3H).
        lane = lax.broadcasted_iota(jnp.int32, (TB, 4 * H), 1)
        g_lanes = (lane >= 2 * H) & (lane < 3 * H)
        pre_scale = jnp.where(g_lanes, 2.0, 1.0).astype(jnp.float32)
        post_add = jnp.where(g_lanes, -1.0, 0.0).astype(jnp.float32)

        def make_step(base):
            def step(t, carry):
                h, c = carry
                idx = base + t
                # Recurrent matmul only; x @ W_ih + bias hoisted to the wrapper.
                gates = xp_ref[idx] + jnp.dot(
                    h.astype(whh_ref.dtype), whh_ref[...],
                    preferred_element_type=jnp.float32)        # (TB, 4H) f32
                # One EUP pass (sigmoid) over the full block; the g-gate lanes
                # become tanh via the identity above (VPU pre/post fixup).
                s = jax.nn.sigmoid(gates * pre_scale)
                act = s * pre_scale + post_add
                i_g = act[:, 0:H]
                f_g = act[:, H:2 * H]
                g_g = act[:, 2 * H:3 * H]
                o_g = act[:, 3 * H:4 * H]
                c_new = f_g * c + i_g * g_g
                h_new = o_g * jnp.tanh(c_new)
                if needs_mask:
                    # Only emitted for a ragged last chunk (compile-time flag).
                    valid = (g * t_chunk + idx) < T
                    h_new = jnp.where(valid, h_new, h)
                    c_new = jnp.where(valid, c_new, c)
                return h_new, c_new
            return step

        carry = (h_scr[...], c_scr[...])
        # Two-level time loop: rolled outer loop over sub-blocks, unrolled inner
        # loop (bounds code size while keeping MXU/EUP overlap per sub-block).
        if n_full > 1:
            def outer_body(sb, c_in):
                base = pl.multiple_of(sb * unroll_eff, unroll_eff)
                return lax.fori_loop(0, unroll_eff, make_step(base), c_in,
                                     unroll=True)
            carry = lax.fori_loop(0, n_full, outer_body, carry)
        elif n_full == 1:
            carry = lax.fori_loop(0, unroll_eff, make_step(0), carry,
                                  unroll=True)
        if rem > 0:
            carry = lax.fori_loop(0, rem, make_step(n_full * unroll_eff),
                                  carry, unroll=True)
        h_fin, c_fin = carry
        h_scr[...] = h_fin
        c_scr[...] = c_fin

        @pl.when(g == pl.num_programs(1) - 1)
        def _finalize():
            # Final fc (H -> O, O tiny): VPU multiply + lane reduction per output
            # column instead of an MXU dot on the un-hidden epilogue.  Bias read
            # as scalars from SMEM.
            fcw = fcw_ref[...]                                  # (O, H)
            cols = [jnp.sum(h_fin * fcw[o:o + 1, :], axis=-1, keepdims=True)
                    + fcb_ref[o] for o in range(O)]
            out_ref[...] = cols[0] if O == 1 else jnp.concatenate(cols, axis=1)

    return kernel


@functools.partial(
    jax.jit, static_argnames=("t_chunk", "unroll", "batch_tile", "mxu_dtype"))
def lstm_forward(x, params, *, t_chunk=512, unroll=8, batch_tile=256,
                 mxu_dtype=jnp.bfloat16):
    """x: (B, T, I) float32.  Returns (B, O) float32.

    mxu_dtype controls the recurrent-dot operands only (state/activations/
    accumulation stay f32).  bf16 is the fast default on v5e/v6e/v7x; pass
    jnp.float32 for exact parity with an f32 reference.
    """
    w_ih, w_hh, b_ih, b_hh, fc_w, fc_b = (
        params["w_ih"], params["w_hh"], params["b_ih"], params["b_hh"],
        params["fc_w"], params["fc_b"])
    B, T, I = x.shape
    H = w_hh.shape[1]
    O = fc_w.shape[0]

    # ---- static batch / time tiling ----------------------------------------
    B_pad8 = max(8, -(-B // 8) * 8)                   # f32 sublane multiple
    TB = max(8, (min(batch_tile, B_pad8) // 8) * 8)   # batch tile (MXU rows)
    B_pad = -(-B_pad8 // TB) * TB                     # multiple of the tile
    nb = B_pad // TB
    TCHUNK = min(t_chunk, T)
    n_chunks = -(-T // TCHUNK)

    # ---- hoisted input projection + fused bias (one big XLA matmul) --------
    x_pad = jnp.pad(x.astype(jnp.float32), ((0, B_pad - B), (0, 0), (0, 0)))
    x_tbi = jnp.transpose(x_pad, (1, 0, 2))                         # (T, B_pad, I)
    bias = (b_ih + b_hh).reshape(1, 1, 4 * H).astype(jnp.float32)
    x_proj = jnp.einsum("tbi,gi->tbg", x_tbi, w_ih.astype(jnp.float32),
                        precision=lax.Precision.HIGHEST,
                        preferred_element_type=jnp.float32) + bias   # (T,B_pad,4H)
    # No T-padding: the ragged last time chunk (if any) is handled by the
    # in-kernel validity mask, avoiding an extra full HBM copy of x_proj.

    whh_t = jnp.transpose(w_hh).astype(mxu_dtype)    # (H, 4H) MXU operand
    fcw = fc_w.astype(jnp.float32)                   # (O, H)
    fcb = fc_b.reshape(O).astype(jnp.float32)        # (O,) -> SMEM

    kernel = _make_lstm_kernel(T, TCHUNK, TB, H, O, unroll)

    # Scoped-VMEM budget: double-buffered x_proj stream + weights + scratch with
    # 2x headroom.  (v5e scoped default is 16 MiB; v7x physical VMEM is 64 MiB.)
    mxu_bytes = jnp.dtype(mxu_dtype).itemsize
    est = (2 * TCHUNK * TB * 4 * H * 4        # x_proj double buffer
           + 2 * H * 4 * H * mxu_bytes        # W_hh
           + 2 * O * H * 4 + 2 * TB * O * 4   # fc weight + output
           + 2 * TB * H * 4)                  # h/c scratch
    vmem_limit = int(min(max(2 * est + (2 << 20), 16 << 20), 64 << 20))

    out = pl.pallas_call(
        kernel,
        out_shape=jax.ShapeDtypeStruct((B_pad, O), jnp.float32),
        grid=(nb, n_chunks),
        in_specs=[
            # Time-chunked, double-buffered stream of the projected input.
            pl.BlockSpec((TCHUNK, TB, 4 * H), lambda b, g: (g, b, 0)),
            # Weights stay resident (constant block index => fetched once).
            pl.BlockSpec((H, 4 * H), lambda b, g: (0, 0)),
            pl.BlockSpec((O, H), lambda b, g: (0, 0)),
            # Tiny fc bias lives in SMEM (scalar reads in the epilogue).
            pl.BlockSpec(memory_space=pltpu.MemorySpace.SMEM),
        ],
        # Same output block across the sequential time axis -> written once at end.
        out_specs=pl.BlockSpec((TB, O), lambda b, g: (b, 0)),
        scratch_shapes=[pltpu.VMEM((TB, H), jnp.float32),
                        pltpu.VMEM((TB, H), jnp.float32)],
        compiler_params=pltpu.CompilerParams(
            dimension_semantics=("parallel", "arbitrary"),
            vmem_limit_bytes=vmem_limit),
    )(x_proj, whh_t, fcw, fcb)

    return out[:B]


def init_params(key, input_size=1, hidden_size=32, output_size=1):
    """Deterministic init mimicking PyTorch's U(-1/sqrt(H), 1/sqrt(H))."""
    ks = jax.random.split(key, 6)
    bound = 1.0 / jnp.sqrt(hidden_size)
    u = lambda k, shape: jax.random.uniform(k, shape, jnp.float32, -bound, bound)
    return {
        "w_ih": u(ks[0], (4 * hidden_size, input_size)),
        "w_hh": u(ks[1], (4 * hidden_size, hidden_size)),
        "b_ih": u(ks[2], (4 * hidden_size,)),
        "b_hh": u(ks[3], (4 * hidden_size,)),
        "fc_w": u(ks[4], (output_size, hidden_size)),
        "fc_b": u(ks[5], (output_size,)),
    }


def lstm_forward_ref(x, params):
    """Pure-JAX reference (PyTorch gate order [i,f,g,o], true-f32 matmuls)."""
    w_ih, w_hh = params["w_ih"], params["w_hh"]
    b = params["b_ih"] + params["b_hh"]
    H = w_hh.shape[1]
    B = x.shape[0]
    hi = lax.Precision.HIGHEST

    def cell(carry, x_t):
        h, c = carry
        gates = (jnp.dot(x_t, w_ih.T, precision=hi)
                 + jnp.dot(h, w_hh.T, precision=hi) + b)
        i = jax.nn.sigmoid(gates[:, 0:H])
        f = jax.nn.sigmoid(gates[:, H:2 * H])
        g = jnp.tanh(gates[:, 2 * H:3 * H])
        o = jax.nn.sigmoid(gates[:, 3 * H:4 * H])
        c = f * c + i * g
        h = o * jnp.tanh(c)
        return (h, c), None

    h0 = jnp.zeros((B, H), jnp.float32)
    c0 = jnp.zeros((B, H), jnp.float32)
    (h_last, _), _ = lax.scan(cell, (h0, c0), jnp.transpose(x, (1, 0, 2)))
    return jnp.dot(h_last, params["fc_w"].T, precision=hi) + params["fc_b"]


if __name__ == "__main__":
    key = jax.random.PRNGKey(0)
    k_x, k_p = jax.random.split(key)

    B, T, I, H, O = 2, 8, 1, 32, 1
    x = jax.random.normal(k_x, (B, T, I), dtype=jnp.float32)
    params = init_params(k_p, input_size=I, hidden_size=H, output_size=O)

    ref = lstm_forward_ref(x, params)

    # Exact-parity path: f32 MXU operands, tight tolerance.
    out_f32 = jax.block_until_ready(lstm_forward(x, params, mxu_dtype=jnp.float32))
    assert out_f32.shape == (B, O), out_f32.shape
    assert jnp.allclose(out_f32, ref, atol=1e-3, rtol=1e-3), (out_f32, ref)

    # Default fast path (bf16 MXU operands): looser tolerance since W_hh and h
    # are rounded to bf16 at the recurrent dot every step.
    out_bf16 = jax.block_until_ready(lstm_forward(x, params))
    assert out_bf16.shape == (B, O), out_bf16.shape
    assert jnp.allclose(out_bf16, ref, atol=5e-2, rtol=5e-2), (out_bf16, ref)

    print("KERNEL_OK")
</pallas_src>

<mosaic_0001>
module attributes {stable_mosaic.version = 11 : i64} {
  func.func @kernel(%arg0: i32, %arg1: i32, %arg2: memref<8x8x128xf32, #tpu.memory_space<vmem>>, %arg3: memref<32x128xf32, #tpu.memory_space<vmem>>, %arg4: memref<1x32xf32, #tpu.memory_space<vmem>>, %arg5: memref<1xf32, #tpu.memory_space<smem>>, %arg6: memref<8x1xf32, #tpu.memory_space<vmem>>, %arg7: memref<8x32xf32, #tpu.memory_space<vmem>>, %arg8: memref<8x32xf32, #tpu.memory_space<vmem>>) attributes {dimension_semantics = [#tpu.dimension_semantics<parallel>, #tpu.dimension_semantics<arbitrary>], iteration_bounds = array<i64: 1, 1>, scalar_prefetch = 0 : i64, scratch_operands = 2 : i64, tpu.core_type = #tpu.core_type<tc>, window_params = [{transform_indices = @transform_0, window_bounds = array<i64: 8, 8, 128>}, {pipeline_mode = #tpu.pipeline_mode<synchronous>, transform_indices = @transform_1, window_bounds = array<i64: 32, 128>}, {pipeline_mode = #tpu.pipeline_mode<synchronous>, transform_indices = @transform_2, window_bounds = array<i64: 1, 32>}, {transform_indices = @transform_3, window_bounds = array<i64: 1>}, {transform_indices = @transform_4, window_bounds = array<i64: 8, 1>}]} {
    %c0_i32 = arith.constant 0 : i32
    %0 = arith.cmpi eq, %arg1, %c0_i32 : i32
    %1 = arith.extui %0 : i1 to i32
    %c0_i32_0 = arith.constant 0 : i32
    %2 = arith.cmpi ne, %1, %c0_i32_0 : i32
    scf.if %2 {
      %cst_70 = arith.constant 0.000000e+00 : f32
      %214 = vector.broadcast %cst_70 : f32 to vector<8x32xf32>
      %c0_71 = arith.constant 0 : index
      %c0_72 = arith.constant 0 : index
      %215 = vector.load %arg7[%c0_71, %c0_72] : memref<8x32xf32, #tpu.memory_space<vmem>>, vector<8x32xf32>
      tpu.vector_store %arg7[%c0_71, %c0_72], %214 {strides = array<i32>} : memref<8x32xf32, #tpu.memory_space<vmem>>, vector<8x32xf32>,
      %cst_73 = arith.constant 0.000000e+00 : f32
      %216 = vector.broadcast %cst_73 : f32 to vector<8x32xf32>
      %c0_74 = arith.constant 0 : index
      %c0_75 = arith.constant 0 : index
      %217 = vector.load %arg8[%c0_74, %c0_75] : memref<8x32xf32, #tpu.memory_space<vmem>>, vector<8x32xf32>
      tpu.vector_store %arg8[%c0_74, %c0_75], %216 {strides = array<i32>} : memref<8x32xf32, #tpu.memory_space<vmem>>, vector<8x32xf32>,
    } else {
    }
    %3 = tpu.iota {dimensions = array<i32: 1>} : vector<8x128xi32>
    %c64_i32 = arith.constant 64 : i32
    %4 = vector.broadcast %c64_i32 : i32 to vector<8x128xi32>
    %5 = arith.cmpi sge, %3, %4 : vector<8x128xi32>
    %c96_i32 = arith.constant 96 : i32
    %6 = vector.broadcast %c96_i32 : i32 to vector<8x128xi32>
    %7 = arith.cmpi slt, %3, %6 : vector<8x128xi32>
    %8 = arith.andi %5, %7 : vector<8x128xi1>
    %cst = arith.constant 2.000000e+00 : f32
    %cst_1 = arith.constant 1.000000e+00 : f32
    %9 = vector.broadcast %cst : f32 to vector<8x128xf32>
    %10 = vector.broadcast %cst_1 : f32 to vector<8x128xf32>
    %11 = arith.select %8, %9, %10 : vector<8x128xi1>, vector<8x128xf32>
    %cst_2 = arith.constant -1.000000e+00 : f32
    %cst_3 = arith.constant 0.000000e+00 : f32
    %12 = vector.broadcast %cst_2 : f32 to vector<8x128xf32>
    %13 = vector.broadcast %cst_3 : f32 to vector<8x128xf32>
    %14 = arith.select %8, %12, %13 : vector<8x128xi1>, vector<8x128xf32>
    %c0 = arith.constant 0 : index
    %c0_4 = arith.constant 0 : index
    %15 = vector.load %arg7[%c0, %c0_4] : memref<8x32xf32, #tpu.memory_space<vmem>>, vector<8x32xf32>
    %c0_5 = arith.constant 0 : index
    %c0_6 = arith.constant 0 : index
    %16 = vector.load %arg8[%c0_5, %c0_6] : memref<8x32xf32, #tpu.memory_space<vmem>>, vector<8x32xf32>
    %c0_i32_7 = arith.constant 0 : i32
    %c0_i32_8 = arith.constant 0 : i32
    %17 = arith.addi %c0_i32_8, %c0_i32_7 : i32
    %18 = arith.index_cast %17 : i32 to index
    %c0_9 = arith.constant 0 : index
    %c0_10 = arith.constant 0 : index
    %19 = vector.load %arg2[%18, %c0_9, %c0_10] : memref<8x8x128xf32, #tpu.memory_space<vmem>>, vector<1x8x128xf32>
    %20 = vector.shape_cast %19 : vector<1x8x128xf32> to vector<8x128xf32>
    %c0_11 = arith.constant 0 : index
    %c0_12 = arith.constant 0 : index
    %21 = vector.load %arg3[%c0_11, %c0_12] : memref<32x128xf32, #tpu.memory_space<vmem>>, vector<32x128xf32>
    %cst_13 = arith.constant dense<0.000000e+00> : vector<8x128xf32>
    %22 = tpu.matmul %15, %21, %cst_13 {dimension_numbers = #tpu.dot_dimension_numbers<[1], [0], [0], [1], [0, 0, 1, 1], [], []>} : vector<8x32xf32>, vector<32x128xf32>, vector<8x128xf32> -> vector<8x128xf32>
    %23 = arith.addf %20, %22 : vector<8x128xf32>
    %24 = arith.mulf %23, %11 : vector<8x128xf32>
    %25 = arith.negf %24 : vector<8x128xf32>
    %26 = math.exp %25 : vector<8x128xf32>
    %cst_14 = arith.constant 1.000000e+00 : f32
    %27 = vector.broadcast %cst_14 : f32 to vector<8x128xf32>
    %28 = arith.addf %27, %26 : vector<8x128xf32>
    %29 = arith.divf %27, %28 : vector<8x128xf32>
    %30 = arith.mulf %29, %11 : vector<8x128xf32>
    %31 = arith.addf %30, %14 : vector<8x128xf32>
    %32 = vector.extract_strided_slice %31 {offsets = [0, 0], sizes = [8, 32], strides = [1, 1]} : vector<8x128xf32> to vector<8x32xf32>
    %33 = vector.extract_strided_slice %31 {offsets = [0, 32], sizes = [8, 32], strides = [1, 1]} : vector<8x128xf32> to vector<8x32xf32>
    %34 = vector.extract_strided_slice %31 {offsets = [0, 64], sizes = [8, 32], strides = [1, 1]} : vector<8x128xf32> to vector<8x32xf32>
    %35 = vector.extract_strided_slice %31 {offsets = [0, 96], sizes = [8, 32], strides = [1, 1]} : vector<8x128xf32> to vector<8x32xf32>
    %36 = arith.mulf %33, %16 : vector<8x32xf32>
    %37 = arith.mulf %32, %34 : vector<8x32xf32>
    %38 = arith.addf %36, %37 : vector<8x32xf32>
    %39 = math.tanh %38 : vector<8x32xf32>
    %40 = arith.mulf %35, %39 : vector<8x32xf32>
    %c1_i32 = arith.constant 1 : i32
    %c0_i32_15 = arith.constant 0 : i32
    %41 = arith.addi %c0_i32_15, %c1_i32 : i32
    %42 = arith.index_cast %41 : i32 to index
    %c0_16 = arith.constant 0 : index
    %c0_17 = arith.constant 0 : index
    %43 = vector.load %arg2[%42, %c0_16, %c0_17] : memref<8x8x128xf32, #tpu.memory_space<vmem>>, vector<1x8x128xf32>
    %44 = vector.shape_cast %43 : vector<1x8x128xf32> to vector<8x128xf32>
    %c0_18 = arith.constant 0 : index
    %c0_19 = arith.constant 0 : index
    %45 = vector.load %arg3[%c0_18, %c0_19] : memref<32x128xf32, #tpu.memory_space<vmem>>, vector<32x128xf32>
    %cst_20 = arith.constant dense<0.000000e+00> : vector<8x128xf32>
    %46 = tpu.matmul %40, %45, %cst_20 {dimension_numbers = #tpu.dot_dimension_numbers<[1], [0], [0], [1], [0, 0, 1, 1], [], []>} : vector<8x32xf32>, vector<32x128xf32>, vector<8x128xf32> -> vector<8x128xf32>
    %47 = arith.addf %44, %46 : vector<8x128xf32>
    %48 = arith.mulf %47, %11 : vector<8x128xf32>
    %49 = arith.negf %48 : vector<8x128xf32>
    %50 = math.exp %49 : vector<8x128xf32>
    %cst_21 = arith.constant 1.000000e+00 : f32
    %51 = vector.broadcast %cst_21 : f32 to vector<8x128xf32>
    %52 = arith.addf %51, %50 : vector<8x128xf32>
    %53 = arith.divf %51, %52 : vector<8x128xf32>
    %54 = arith.mulf %53, %11 : vector<8x128xf32>
    %55 = arith.addf %54, %14 : vector<8x128xf32>
    %56 = vector.extract_strided_slice %55 {offsets = [0, 0], sizes = [8, 32], strides = [1, 1]} : vector<8x128xf32> to vector<8x32xf32>
    %57 = vector.extract_strided_slice %55 {offsets = [0, 32], sizes = [8, 32], strides = [1, 1]} : vector<8x128xf32> to vector<8x32xf32>
    %58 = vector.extract_strided_slice %55 {offsets = [0, 64], sizes = [8, 32], strides = [1, 1]} : vector<8x128xf32> to vector<8x32xf32>
    %59 = vector.extract_strided_slice %55 {offsets = [0, 96], sizes = [8, 32], strides = [1, 1]} : vector<8x128xf32> to vector<8x32xf32>
    %60 = arith.mulf %57, %38 : vector<8x32xf32>
    %61 = arith.mulf %56, %58 : vector<8x32xf32>
    %62 = arith.addf %60, %61 : vector<8x32xf32>
    %63 = math.tanh %62 : vector<8x32xf32>
    %64 = arith.mulf %59, %63 : vector<8x32xf32>
    %c2_i32 = arith.constant 2 : i32
    %c0_i32_22 = arith.constant 0 : i32
    %65 = arith.addi %c0_i32_22, %c2_i32 : i32
    %66 = arith.index_cast %65 : i32 to index
    %c0_23 = arith.constant 0 : index
    %c0_24 = arith.constant 0 : index
    %67 = vector.load %arg2[%66, %c0_23, %c0_24] : memref<8x8x128xf32, #tpu.memory_space<vmem>>, vector<1x8x128xf32>
    %68 = vector.shape_cast %67 : vector<1x8x128xf32> to vector<8x128xf32>
    %c0_25 = arith.constant 0 : index
    %c0_26 = arith.constant 0 : index
    %69 = vector.load %arg3[%c0_25, %c0_26] : memref<32x128xf32, #tpu.memory_space<vmem>>, vector<32x128xf32>
    %cst_27 = arith.constant dense<0.000000e+00> : vector<8x128xf32>
    %70 = tpu.matmul %64, %69, %cst_27 {dimension_numbers = #tpu.dot_dimension_numbers<[1], [0], [0], [1], [0, 0, 1, 1], [], []>} : vector<8x32xf32>, vector<32x128xf32>, vector<8x128xf32> -> vector<8x128xf32>
    %71 = arith.addf %68, %70 : vector<8x128xf32>
    %72 = arith.mulf %71, %11 : vector<8x128xf32>
    %73 = arith.negf %72 : vector<8x128xf32>
    %74 = math.exp %73 : vector<8x128xf32>
    %cst_28 = arith.constant 1.000000e+00 : f32
    %75 = vector.broadcast %cst_28 : f32 to vector<8x128xf32>
    %76 = arith.addf %75, %74 : vector<8x128xf32>
    %77 = arith.divf %75, %76 : vector<8x128xf32>
    %78 = arith.mulf %77, %11 : vector<8x128xf32>
    %79 = arith.addf %78, %14 : vector<8x128xf32>
    %80 = vector.extract_strided_slice %79 {offsets = [0, 0], sizes = [8, 32], strides = [1, 1]} : vector<8x128xf32> to vector<8x32xf32>
    %81 = vector.extract_strided_slice %79 {offsets = [0, 32], sizes = [8, 32], strides = [1, 1]} : vector<8x128xf32> to vector<8x32xf32>
    %82 = vector.extract_strided_slice %79 {offsets = [0, 64], sizes = [8, 32], strides = [1, 1]} : vector<8x128xf32> to vector<8x32xf32>
    %83 = vector.extract_strided_slice %79 {offsets = [0, 96], sizes = [8, 32], strides = [1, 1]} : vector<8x128xf32> to vector<8x32xf32>
    %84 = arith.mulf %81, %62 : vector<8x32xf32>
    %85 = arith.mulf %80, %82 : vector<8x32xf32>
    %86 = arith.addf %84, %85 : vector<8x32xf32>
    %87 = math.tanh %86 : vector<8x32xf32>
    %88 = arith.mulf %83, %87 : vector<8x32xf32>
    %c3_i32 = arith.constant 3 : i32
    %c0_i32_29 = arith.constant 0 : i32
    %89 = arith.addi %c0_i32_29, %c3_i32 : i32
    %90 = arith.index_cast %89 : i32 to index
    %c0_30 = arith.constant 0 : index
    %c0_31 = arith.constant 0 : index
    %91 = vector.load %arg2[%90, %c0_30, %c0_31] : memref<8x8x128xf32, #tpu.memory_space<vmem>>, vector<1x8x128xf32>
    %92 = vector.shape_cast %91 : vector<1x8x128xf32> to vector<8x128xf32>
    %c0_32 = arith.constant 0 : index
    %c0_33 = arith.constant 0 : index
    %93 = vector.load %arg3[%c0_32, %c0_33] : memref<32x128xf32, #tpu.memory_space<vmem>>, vector<32x128xf32>
    %cst_34 = arith.constant dense<0.000000e+00> : vector<8x128xf32>
    %94 = tpu.matmul %88, %93, %cst_34 {dimension_numbers = #tpu.dot_dimension_numbers<[1], [0], [0], [1], [0, 0, 1, 1], [], []>} : vector<8x32xf32>, vector<32x128xf32>, vector<8x128xf32> -> vector<8x128xf32>
    %95 = arith.addf %92, %94 : vector<8x128xf32>
    %96 = arith.mulf %95, %11 : vector<8x128xf32>
    %97 = arith.negf %96 : vector<8x128xf32>
    %98 = math.exp %97 : vector<8x128xf32>
    %cst_35 = arith.constant 1.000000e+00 : f32
    %99 = vector.broadcast %cst_35 : f32 to vector<8x128xf32>
    %100 = arith.addf %99, %98 : vector<8x128xf32>
    %101 = arith.divf %99, %100 : vector<8x128xf32>
    %102 = arith.mulf %101, %11 : vector<8x128xf32>
    %103 = arith.addf %102, %14 : vector<8x128xf32>
    %104 = vector.extract_strided_slice %103 {offsets = [0, 0], sizes = [8, 32], strides = [1, 1]} : vector<8x128xf32> to vector<8x32xf32>
    %105 = vector.extract_strided_slice %103 {offsets = [0, 32], sizes = [8, 32], strides = [1, 1]} : vector<8x128xf32> to vector<8x32xf32>
    %106 = vector.extract_strided_slice %103 {offsets = [0, 64], sizes = [8, 32], strides = [1, 1]} : vector<8x128xf32> to vector<8x32xf32>
    %107 = vector.extract_strided_slice %103 {offsets = [0, 96], sizes = [8, 32], strides = [1, 1]} : vector<8x128xf32> to vector<8x32xf32>
    %108 = arith.mulf %105, %86 : vector<8x32xf32>
    %109 = arith.mulf %104, %106 : vector<8x32xf32>
    %110 = arith.addf %108, %109 : vector<8x32xf32>
    %111 = math.tanh %110 : vector<8x32xf32>
    %112 = arith.mulf %107, %111 : vector<8x32xf32>
    %c4_i32 = arith.constant 4 : i32
    %c0_i32_36 = arith.constant 0 : i32
    %113 = arith.addi %c0_i32_36, %c4_i32 : i32
    %114 = arith.index_cast %113 : i32 to index
    %c0_37 = arith.constant 0 : index
    %c0_38 = arith.constant 0 : index
    %115 = vector.load %arg2[%114, %c0_37, %c0_38] : memref<8x8x128xf32, #tpu.memory_space<vmem>>, vector<1x8x128xf32>
    %116 = vector.shape_cast %115 : vector<1x8x128xf32> to vector<8x128xf32>
    %c0_39 = arith.constant 0 : index
    %c0_40 = arith.constant 0 : index
    %117 = vector.load %arg3[%c0_39, %c0_40] : memref<32x128xf32, #tpu.memory_space<vmem>>, vector<32x128xf32>
    %cst_41 = arith.constant dense<0.000000e+00> : vector<8x128xf32>
    %118 = tpu.matmul %112, %117, %cst_41 {dimension_numbers = #tpu.dot_dimension_numbers<[1], [0], [0], [1], [0, 0, 1, 1], [], []>} : vector<8x32xf32>, vector<32x128xf32>, vector<8x128xf32> -> vector<8x128xf32>
    %119 = arith.addf %116, %118 : vector<8x128xf32>
    %120 = arith.mulf %119, %11 : vector<8x128xf32>
    %121 = arith.negf %120 : vector<8x128xf32>
    %122 = math.exp %121 : vector<8x128xf32>
    %cst_42 = arith.constant 1.000000e+00 : f32
    %123 = vector.broadcast %cst_42 : f32 to vector<8x128xf32>
    %124 = arith.addf %123, %122 : vector<8x128xf32>
    %125 = arith.divf %123, %124 : vector<8x128xf32>
    %126 = arith.mulf %125, %11 : vector<8x128xf32>
    %127 = arith.addf %126, %14 : vector<8x128xf32>
    %128 = vector.extract_strided_slice %127 {offsets = [0, 0], sizes = [8, 32], strides = [1, 1]} : vector<8x128xf32> to vector<8x32xf32>
    %129 = vector.extract_strided_slice %127 {offsets = [0, 32], sizes = [8, 32], strides = [1, 1]} : vector<8x128xf32> to vector<8x32xf32>
    %130 = vector.extract_strided_slice %127 {offsets = [0, 64], sizes = [8, 32], strides = [1, 1]} : vector<8x128xf32> to vector<8x32xf32>
    %131 = vector.extract_strided_slice %127 {offsets = [0, 96], sizes = [8, 32], strides = [1, 1]} : vector<8x128xf32> to vector<8x32xf32>
    %132 = arith.mulf %129, %110 : vector<8x32xf32>
    %133 = arith.mulf %128, %130 : vector<8x32xf32>
    %134 = arith.addf %132, %133 : vector<8x32xf32>
    %135 = math.tanh %134 : vector<8x32xf32>
    %136 = arith.mulf %131, %135 : vector<8x32xf32>
    %c5_i32 = arith.constant 5 : i32
    %c0_i32_43 = arith.constant 0 : i32
    %137 = arith.addi %c0_i32_43, %c5_i32 : i32
    %138 = arith.index_cast %137 : i32 to index
    %c0_44 = arith.constant 0 : index
    %c0_45 = arith.constant 0 : index
    %139 = vector.load %arg2[%138, %c0_44, %c0_45] : memref<8x8x128xf32, #tpu.memory_space<vmem>>, vector<1x8x128xf32>
    %140 = vector.shape_cast %139 : vector<1x8x128xf32> to vector<8x128xf32>
    %c0_46 = arith.constant 0 : index
    %c0_47 = arith.constant 0 : index
    %141 = vector.load %arg3[%c0_46, %c0_47] : memref<32x128xf32, #tpu.memory_space<vmem>>, vector<32x128xf32>
    %cst_48 = arith.constant dense<0.000000e+00> : vector<8x128xf32>
    %142 = tpu.matmul %136, %141, %cst_48 {dimension_numbers = #tpu.dot_dimension_numbers<[1], [0], [0], [1], [0, 0, 1, 1], [], []>} : vector<8x32xf32>, vector<32x128xf32>, vector<8x128xf32> -> vector<8x128xf32>
    %143 = arith.addf %140, %142 : vector<8x128xf32>
    %144 = arith.mulf %143, %11 : vector<8x128xf32>
    %145 = arith.negf %144 : vector<8x128xf32>
    %146 = math.exp %145 : vector<8x128xf32>
    %cst_49 = arith.constant 1.000000e+00 : f32
    %147 = vector.broadcast %cst_49 : f32 to vector<8x128xf32>
    %148 = arith.addf %147, %146 : vector<8x128xf32>
    %149 = arith.divf %147, %148 : vector<8x128xf32>
    %150 = arith.mulf %149, %11 : vector<8x128xf32>
    %151 = arith.addf %150, %14 : vector<8x128xf32>
    %152 = vector.extract_strided_slice %151 {offsets = [0, 0], sizes = [8, 32], strides = [1, 1]} : vector<8x128xf32> to vector<8x32xf32>
    %153 = vector.extract_strided_slice %151 {offsets = [0, 32], sizes = [8, 32], strides = [1, 1]} : vector<8x128xf32> to vector<8x32xf32>
    %154 = vector.extract_strided_slice %151 {offsets = [0, 64], sizes = [8, 32], strides = [1, 1]} : vector<8x128xf32> to vector<8x32xf32>
    %155 = vector.extract_strided_slice %151 {offsets = [0, 96], sizes = [8, 32], strides = [1, 1]} : vector<8x128xf32> to vector<8x32xf32>
    %156 = arith.mulf %153, %134 : vector<8x32xf32>
    %157 = arith.mulf %152, %154 : vector<8x32xf32>
    %158 = arith.addf %156, %157 : vector<8x32xf32>
    %159 = math.tanh %158 : vector<8x32xf32>
    %160 = arith.mulf %155, %159 : vector<8x32xf32>
    %c6_i32 = arith.constant 6 : i32
    %c0_i32_50 = arith.constant 0 : i32
    %161 = arith.addi %c0_i32_50, %c6_i32 : i32
    %162 = arith.index_cast %161 : i32 to index
    %c0_51 = arith.constant 0 : index
    %c0_52 = arith.constant 0 : index
    %163 = vector.load %arg2[%162, %c0_51, %c0_52] : memref<8x8x128xf32, #tpu.memory_space<vmem>>, vector<1x8x128xf32>
    %164 = vector.shape_cast %163 : vector<1x8x128xf32> to vector<8x128xf32>
    %c0_53 = arith.constant 0 : index
    %c0_54 = arith.constant 0 : index
    %165 = vector.load %arg3[%c0_53, %c0_54] : memref<32x128xf32, #tpu.memory_space<vmem>>, vector<32x128xf32>
    %cst_55 = arith.constant dense<0.000000e+00> : vector<8x128xf32>
    %166 = tpu.matmul %160, %165, %cst_55 {dimension_numbers = #tpu.dot_dimension_numbers<[1], [0], [0], [1], [0, 0, 1, 1], [], []>} : vector<8x32xf32>, vector<32x128xf32>, vector<8x128xf32> -> vector<8x128xf32>
    %167 = arith.addf %164, %166 : vector<8x128xf32>
    %168 = arith.mulf %167, %11 : vector<8x128xf32>
    %169 = arith.negf %168 : vector<8x128xf32>
    %170 = math.exp %169 : vector<8x128xf32>
    %cst_56 = arith.constant 1.000000e+00 : f32
    %171 = vector.broadcast %cst_56 : f32 to vector<8x128xf32>
    %172 = arith.addf %171, %170 : vector<8x128xf32>
    %173 = arith.divf %171, %172 : vector<8x128xf32>
    %174 = arith.mulf %173, %11 : vector<8x128xf32>
    %175 = arith.addf %174, %14 : vector<8x128xf32>
    %176 = vector.extract_strided_slice %175 {offsets = [0, 0], sizes = [8, 32], strides = [1, 1]} : vector<8x128xf32> to vector<8x32xf32>
    %177 = vector.extract_strided_slice %175 {offsets = [0, 32], sizes = [8, 32], strides = [1, 1]} : vector<8x128xf32> to vector<8x32xf32>
    %178 = vector.extract_strided_slice %175 {offsets = [0, 64], sizes = [8, 32], strides = [1, 1]} : vector<8x128xf32> to vector<8x32xf32>
    %179 = vector.extract_strided_slice %175 {offsets = [0, 96], sizes = [8, 32], strides = [1, 1]} : vector<8x128xf32> to vector<8x32xf32>
    %180 = arith.mulf %177, %158 : vector<8x32xf32>
    %181 = arith.mulf %176, %178 : vector<8x32xf32>
    %182 = arith.addf %180, %181 : vector<8x32xf32>
    %183 = math.tanh %182 : vector<8x32xf32>
    %184 = arith.mulf %179, %183 : vector<8x32xf32>
    %c7_i32 = arith.constant 7 : i32
    %c0_i32_57 = arith.constant 0 : i32
    %185 = arith.addi %c0_i32_57, %c7_i32 : i32
    %186 = arith.index_cast %185 : i32 to index
    %c0_58 = arith.constant 0 : index
    %c0_59 = arith.constant 0 : index
    %187 = vector.load %arg2[%186, %c0_58, %c0_59] : memref<8x8x128xf32, #tpu.memory_space<vmem>>, vector<1x8x128xf32>
    %188 = vector.shape_cast %187 : vector<1x8x128xf32> to vector<8x128xf32>
    %c0_60 = arith.constant 0 : index
    %c0_61 = arith.constant 0 : index
    %189 = vector.load %arg3[%c0_60, %c0_61] : memref<32x128xf32, #tpu.memory_space<vmem>>, vector<32x128xf32>
    %cst_62 = arith.constant dense<0.000000e+00> : vector<8x128xf32>
    %190 = tpu.matmul %184, %189, %cst_62 {dimension_numbers = #tpu.dot_dimension_numbers<[1], [0], [0], [1], [0, 0, 1, 1], [], []>} : vector<8x32xf32>, vector<32x128xf32>, vector<8x128xf32> -> vector<8x128xf32>
    %191 = arith.addf %188, %190 : vector<8x128xf32>
    %192 = arith.mulf %191, %11 : vector<8x128xf32>
    %193 = arith.negf %192 : vector<8x128xf32>
    %194 = math.exp %193 : vector<8x128xf32>
    %cst_63 = arith.constant 1.000000e+00 : f32
    %195 = vector.broadcast %cst_63 : f32 to vector<8x128xf32>
    %196 = arith.addf %195, %194 : vector<8x128xf32>
    %197 = arith.divf %195, %196 : vector<8x128xf32>
    %198 = arith.mulf %197, %11 : vector<8x128xf32>
    %199 = arith.addf %198, %14 : vector<8x128xf32>
    %200 = vector.extract_strided_slice %199 {offsets = [0, 0], sizes = [8, 32], strides = [1, 1]} : vector<8x128xf32> to vector<8x32xf32>
    %201 = vector.extract_strided_slice %199 {offsets = [0, 32], sizes = [8, 32], strides = [1, 1]} : vector<8x128xf32> to vector<8x32xf32>
    %202 = vector.extract_strided_slice %199 {offsets = [0, 64], sizes = [8, 32], strides = [1, 1]} : vector<8x128xf32> to vector<8x32xf32>
    %203 = vector.extract_strided_slice %199 {offsets = [0, 96], sizes = [8, 32], strides = [1, 1]} : vector<8x128xf32> to vector<8x32xf32>
    %204 = arith.mulf %201, %182 : vector<8x32xf32>
    %205 = arith.mulf %200, %202 : vector<8x32xf32>
    %206 = arith.addf %204, %205 : vector<8x32xf32>
    %207 = math.tanh %206 : vector<8x32xf32>
    %208 = arith.mulf %203, %207 : vector<8x32xf32>
    %c8_i32 = arith.constant 8 : i32
    %c0_64 = arith.constant 0 : index
    %c0_65 = arith.constant 0 : index
    %209 = vector.load %arg7[%c0_64, %c0_65] : memref<8x32xf32, #tpu.memory_space<vmem>>, vector<8x32xf32>
    tpu.vector_store %arg7[%c0_64, %c0_65], %208 {strides = array<i32>} : memref<8x32xf32, #tpu.memory_space<vmem>>, vector<8x32xf32>,
    %c0_66 = arith.constant 0 : index
    %c0_67 = arith.constant 0 : index
    %210 = vector.load %arg8[%c0_66, %c0_67] : memref<8x32xf32, #tpu.memory_space<vmem>>, vector<8x32xf32>
    tpu.vector_store %arg8[%c0_66, %c0_67], %206 {strides = array<i32>} : memref<8x32xf32, #tpu.memory_space<vmem>>, vector<8x32xf32>,
    %c0_i32_68 = arith.constant 0 : i32
    %211 = arith.cmpi eq, %arg1, %c0_i32_68 : i32
    %212 = arith.extui %211 : i1 to i32
    %c0_i32_69 = arith.constant 0 : i32
    %213 = arith.cmpi ne, %212, %c0_i32_69 : i32
    scf.if %213 {
      %c0_70 = arith.constant 0 : index
      %c0_71 = arith.constant 0 : index
      %214 = vector.load %arg4[%c0_70, %c0_71] : memref<1x32xf32, #tpu.memory_space<vmem>>, vector<1x32xf32>
      %215 = vector.broadcast %214 : vector<1x32xf32> to vector<8x32xf32>
      %216 = arith.mulf %208, %215 : vector<8x32xf32>
      %cst_72 = arith.constant dense<0.000000e+00> : vector<8xf32>
      %217 = vector.multi_reduction <add>, %216, %cst_72 [1] : vector<8x32xf32> to vector<8xf32>
      %218 = vector.shape_cast %217 : vector<8xf32> to vector<8x1xf32>
      %c0_73 = arith.constant 0 : index
      %219 = memref.load %arg5[%c0_73] : memref<1xf32, #tpu.memory_space<smem>>
      %220 = vector.broadcast %219 : f32 to vector<8x1xf32>
      %221 = arith.addf %218, %220 : vector<8x1xf32>
      %c0_74 = arith.constant 0 : index
      %c0_75 = arith.constant 0 : index
      %222 = vector.load %arg6[%c0_74, %c0_75] : memref<8x1xf32, #tpu.memory_space<vmem>>, vector<8x1xf32>
      tpu.vector_store %arg6[%c0_74, %c0_75], %221 {strides = array<i32>} : memref<8x1xf32, #tpu.memory_space<vmem>>, vector<8x1xf32>,
    } else {
    }
    return
  }
  func.func @transform_0(%arg0: i32, %arg1: i32) -> (i32, i32, i32) {
    %c0_i32 = arith.constant 0 : i32
    %c0_i32_0 = arith.constant 0 : i32
    return %arg1, %arg0, %c0_i32 : i32, i32, i32
  }
  func.func @transform_1(%arg0: i32, %arg1: i32) -> (i32, i32) {
    %c0_i32 = arith.constant 0 : i32
    %c0_i32_0 = arith.constant 0 : i32
    %c0_i32_1 = arith.constant 0 : i32
    return %c0_i32, %c0_i32_0 : i32, i32
  }
  func.func @transform_2(%arg0: i32, %arg1: i32) -> (i32, i32) {
    %c0_i32 = arith.constant 0 : i32
    %c0_i32_0 = arith.constant 0 : i32
    %c0_i32_1 = arith.constant 0 : i32
    return %c0_i32, %c0_i32_0 : i32, i32
  }
  func.func @transform_3(%arg0: i32, %arg1: i32) -> i32 {
    %c0_i32 = arith.constant 0 : i32
    %c0_i32_0 = arith.constant 0 : i32
    return %c0_i32 : i32
  }
  func.func @transform_4(%arg0: i32, %arg1: i32) -> (i32, i32) {
    %c0_i32 = arith.constant 0 : i32
    %c0_i32_0 = arith.constant 0 : i32
    return %arg0, %c0_i32 : i32, i32
  }
}

</mosaic_0001>

<bundles_post_ra>
// kernel: lstm_forward.1
= control target key start
LH: loop header
LB: loop body
LE: loop exit
PB: predicated region body
PF: predicated region fallthrough
CT: control target
= control target key end

     0   :  { %vm22_vm0 = vcmask 261120   ;;  %v1117_v0 = vmov 0.0   ;;  %vm1118_vm1 = vmmov 0   ;;  %v25_v6 = vlaneseq  ;;  %s1120_s24 = smov 64   ;;  %s1121_s25 = smov 32   ;;  %s1359_s1 = inlined_call_operand.vmem [shape: f32[32,128], index: 1, kind: input, shape index: {}]   ;;  %s1360_s0 = inlined_call_operand.vmem [shape: f32[8,8,128], index: 0, kind: input, shape index: {}]   ;;  %s1361_s2 = inlined_call_operand.vmem [shape: f32[1,32], index: 2, kind: input, shape index: {}]   ;;  %s1362_s3 = inlined_call_operand.<no memory space> [shape: f32[1], index: 3, kind: input, shape index: {}]   ;;  %s1363_s4 = inlined_call_operand.vmem [shape: f32[8,1], index: 4, kind: output, shape index: {}]  }
   0x1   :  { %975 = vmatprep.subr.mxu0 %v1117_v0  ;;  %v1152_v1 = vld [vmem:[%s1359_s1 + $0x18] sm:$0xff]  ;;  %v1157_v2 = vld [vmem:[%s1359_s1 + $0x10] sm:$0xff]  ;;  %983 = vmatprep.mubr.msk.f32.mxu0 %vm1118_vm1, %v1117_v0  ;;  %23 = vst.msk [vmem:[#allocation2] sm:$0xff] %vm22_vm0, %v1117_v0  ;;  %24 = vst.msk [vmem:[#allocation3] sm:$0xff] %vm22_vm0, %v1117_v0  ;;  %v1119_v9 = vmov 1.0   ;;  %s1122_s15 = smov 96  }
   0x2   :  { %976 = vmatpush3.msra.mxu0 %v1152_v1  ;;  %986 = vmatprep.subr.mxu1 %v1117_v0  ;;  %v1171_v3 = vld [vmem:[%s1359_s1 + $0x8] sm:$0xff]  ;;  %v1180_v4 = vld [vmem:[%s1359_s1] sm:$0xff]  ;;  %v26_v7 = vand.u32 127, %v25_v6  ;;  %v916_v53 = vld [vmem:[%s1360_s0 + $0x10] sm:$0xff]  ;;  %vm905_vm5 = vcmask 7168  }
   0x3   :  { %977 = vmatprep.subr.mxu0 %v1117_v0  ;;  %987 = vmatpush3.msra.mxu1 %v1152_v1  ;;  %v34_v8 = vld [vmem:[%s1360_s0] sm:$0xff]  ;;  %v913_v33 = vld [vmem:[%s1360_s0 + $0x8] sm:$0xff] }
   0x4   :  { %978 = vmatpush3.msra.mxu0 %v1157_v2  ;;  %988 = vmatprep.subr.mxu1 %v1117_v0  ;;  %vm27_vm2 = vcmp.ge.s32.totalorder %v26_v7, 64  ;;  %vm28_vm3 = vcmp.lt.s32.totalorder %v26_v7, 96 }
   0x5   :  { %979 = vmatprep.subr.mxu0 %v1117_v0  ;;  %989 = vmatpush3.msra.mxu1 %v1157_v2  ;;  %vm29_vm4 = vmand %vm27_vm2, %vm28_vm3 }
   0x6   :  { %980 = vmatpush3.msra.mxu0 %v1171_v3  ;;  %990 = vmatprep.subr.mxu1 %v1117_v0  ;;  %v1208_v10 = vsel %vm29_vm4, 2.0, %v1119_v9  ;;  %v1212_v19 = vsel %vm29_vm4, -1.0, %v1117_v0 }
   0x7   :  { %981 = vmatprep.subr.mxu0 %v1117_v0  ;;  %991 = vmatpush3.msra.mxu1 %v1171_v3 }
   0x8   :  { %982 = vmatpush3.msra.mxu0 %v1180_v4  ;;  %v32_v5 = vld [vmem:[#allocation2] sm:$0xff]  ;;  %992 = vmatprep.subr.mxu1 %v1117_v0  ;;  %v33_v22 = vld [vmem:[#allocation3] sm:$0xff] }
   0x9   :  { %984 = vmatmul.mubr.msk.f32.vlgmr.msra.gmra.mxu0 %vm22_vm0, %v32_v5  ;;  %993 = vmatpush3.msra.mxu1 %v1180_v4 }
   0xa   :  { %994 = vmatprep.mubr.msk.f32.mxu1 %vm1118_vm1, %v1117_v0  ;;  %997 = vmatprep.subr.mxu0 %v1117_v0 }
   0xb   :  { %998 = vmatpush3.msra.mxu0 %v1152_v1  ;;  %1005 = vmatprep.mubr.msk.f32.mxu0 %vm1118_vm1, %v1117_v0 }
   0xc   :  { %999 = vmatprep.subr.mxu0 %v1117_v0  ;;  %1008 = vmatprep.subr.mxu1 %v1117_v0 }
   0xd   :  { %1000 = vmatpush3.msra.mxu0 %v1157_v2 }
   0xe   :  { %1001 = vmatprep.subr.mxu0 %v1117_v0 }
   0xf   :  { %1002 = vmatpush3.msra.mxu0 %v1171_v3 }
  0x10   :  { %1003 = vmatprep.subr.mxu0 %v1117_v0 }
  0x11   :  { %1004 = vmatpush3.msra.mxu0 %v1180_v4 }
  0x12   :  { %1019 = vmatprep.subr.mxu0 %v1117_v0 }
  0xc9   :  { %v109_v11 = vpop.f32.mrf.mxu0 }
  0xca   :  { %v113_v12 = vadd.f32 %v109_v11, %v34_v8 }
  0xcb   :  { %v985_v13 = vpop.f32.mrf.mxu0 }
  0xcc   :  { %v114_v14 = vmul.f32 %v113_v12, %v1208_v10 }
  0xce   :  { %v912_v15 = vmul.f32 -1.442695, %v114_v14 }
  0xd0   :  { %1069 = vpow2.f32 %v912_v15  ;;  %v919_v15 = vld [vmem:[%s1360_s0 + $0x18] sm:$0xff] }
  0xdd   :  { %v1070_v16 = vpop.eup %1069 }
  0xde   :  { %v118_v17 = vadd.f32 1.0, %v1070_v16 }
  0xe0   :  { %1071 = vrcp.f32 %v118_v17 }
  0xed   :  { %v1072_v18 = vpop.eup %1071 }
  0xee   :  { %v121_v20 = vmul.f32 %v1072_v18, %v1208_v10 }
  0xf0   :  { %v122_v21 = vadd.f32 %v121_v20, %v1212_v19 }
  0xf2   :  { %129 = vrot.lane.b32.xlu0 %v122_v21, %s1120_s24 }
  0xf6   :  { %124 = vrot.lane.b32.xlu0 %v33_v22, %s1121_s25 }
 0x164   :  { %v130_v23 = vpop.permute.xlu0 %129 }
 0x165   :  { %v132_v24 = vmul.f32 %v130_v23, %v122_v21 }
 0x167   :  { %134 = vrot.lane.b32.xlu1 %v132_v24, %s1121_s25 }
 0x168   :  { %v125_v25 = vpop.permute.xlu0 %124 }
 0x169   :  { %v127_v26 = vmul.f32 %v125_v25, %v122_v21 }
 0x1d9   :  { %v135_v27 = vpop.permute.xlu1 %134 }
 0x1da   :  { %v137_v28 = vadd.f32 %v135_v27, %v127_v26 }
 0x1dc   :  { %1073 = vtanh.f32 %v137_v28 }
 0x1e9   :  { %v1074_v29 = vpop.eup %1073 }
 0x1ea   :  { %140 = vrot.lane.b32.xlu1 %v1074_v29, %s1120_s24 }
 0x25c   :  { %v141_v30 = vpop.permute.xlu1 %140 }
 0x25d   :  { %v143_v31 = vmul.f32 %v141_v30, %v122_v21 }
 0x25f   :  { %147 = vrot.lane.b32.xlu0 %v143_v31, %s1121_s25 }
 0x2d1   :  { %v148_v32 = vpop.permute.xlu0 %147 }
 0x2d2   :  { %995 = vmatmul.mubr.msk.f32.vlgmr.msra.gmra.mxu1 %vm22_vm0, %v148_v32 }
 0x2d3   :  { %1009 = vmatpush3.msra.mxu1 %v1152_v1  ;;  %1016 = vmatprep.mubr.msk.f32.mxu1 %vm1118_vm1, %v1117_v0 }
 0x2d4   :  { %1010 = vmatprep.subr.mxu1 %v1117_v0 }
 0x2d5   :  { %1011 = vmatpush3.msra.mxu1 %v1157_v2 }
 0x2d6   :  { %1012 = vmatprep.subr.mxu1 %v1117_v0 }
 0x2d7   :  { %1013 = vmatpush3.msra.mxu1 %v1171_v3 }
 0x2d8   :  { %1014 = vmatprep.subr.mxu1 %v1117_v0 }
 0x2d9   :  { %1015 = vmatpush3.msra.mxu1 %v1180_v4 }
 0x2da   :  { %1030 = vmatprep.subr.mxu1 %v1117_v0 }
 0x392   :  { %v217_v34 = vpop.f32.mrf.mxu1 }
 0x393   :  { %v221_v35 = vadd.f32 %v913_v33, %v217_v34 }
 0x394   :  { %v996_v36 = vpop.f32.mrf.mxu1 }
 0x395   :  { %v222_v37 = vmul.f32 %v221_v35, %v1208_v10  ;;  %v922_v36 = vld [vmem:[%s1360_s0 + $0x20] sm:$0xff] }
 0x397   :  { %v915_v38 = vmul.f32 -1.442695, %v222_v37 }
 0x399   :  { %1075 = vpow2.f32 %v915_v38 }
 0x3a6   :  { %v1076_v39 = vpop.eup %1075 }
 0x3a7   :  { %v226_v40 = vadd.f32 1.0, %v1076_v39 }
 0x3a9   :  { %1077 = vrcp.f32 %v226_v40 }
 0x3b6   :  { %v1078_v41 = vpop.eup %1077 }
 0x3b7   :  { %v229_v42 = vmul.f32 %v1078_v41, %v1208_v10 }
 0x3b9   :  { %v230_v43 = vadd.f32 %v229_v42, %v1212_v19 }
 0x3bb   :  { %233 = vrot.lane.b32.xlu1 %v230_v43, %s1120_s24  ;;  %v231_v46 = vmul.f32 %v230_v43, %v137_v28 }
 0x42d   :  { %v234_v44 = vpop.permute.xlu1 %233 }
 0x42e   :  { %v236_v45 = vmul.f32 %v234_v44, %v230_v43 }
 0x430   :  { %238 = vrot.lane.b32.xlu0 %v236_v45, %s1121_s25 }
 0x4a2   :  { %v239_v47 = vpop.permute.xlu0 %238 }
 0x4a3   :  { %v241_v48 = vadd.f32 %v239_v47, %v231_v46 }
 0x4a5   :  { %1079 = vtanh.f32 %v241_v48 }
 0x4b2   :  { %v1080_v49 = vpop.eup %1079 }
 0x4b3   :  { %244 = vrot.lane.b32.xlu1 %v1080_v49, %s1120_s24 }
 0x525   :  { %v245_v50 = vpop.permute.xlu1 %244 }
 0x526   :  { %v247_v51 = vmul.f32 %v245_v50, %v230_v43 }
 0x528   :  { %251 = vrot.lane.b32.xlu0 %v247_v51, %s1121_s25 }
 0x59a   :  { %v252_v52 = vpop.permute.xlu0 %251 }
 0x59b   :  { %1006 = vmatmul.mubr.msk.f32.vlgmr.msra.gmra.mxu0 %vm22_vm0, %v252_v52 }
 0x59c   :  { %1020 = vmatpush3.msra.mxu0 %v1152_v1  ;;  %1027 = vmatprep.mubr.msk.f32.mxu0 %vm1118_vm1, %v1117_v0 }
 0x59d   :  { %1021 = vmatprep.subr.mxu0 %v1117_v0 }
 0x59e   :  { %1022 = vmatpush3.msra.mxu0 %v1157_v2 }
 0x59f   :  { %1023 = vmatprep.subr.mxu0 %v1117_v0 }
 0x5a0   :  { %1024 = vmatpush3.msra.mxu0 %v1171_v3 }
 0x5a1   :  { %1025 = vmatprep.subr.mxu0 %v1117_v0 }
 0x5a2   :  { %1026 = vmatpush3.msra.mxu0 %v1180_v4 }
 0x5a3   :  { %1041 = vmatprep.subr.mxu0 %v1117_v0 }
 0x65b   :  { %v321_v54 = vpop.f32.mrf.mxu0 }
 0x65c   :  { %v325_v55 = vadd.f32 %v916_v53, %v321_v54 }
 0x65d   :  { %v1007_v56 = vpop.f32.mrf.mxu0 }
 0x65e   :  { %v326_v57 = vmul.f32 %v325_v55, %v1208_v10  ;;  %v925_v56 = vld [vmem:[%s1360_s0 + $0x28] sm:$0xff] }
 0x660   :  { %v918_v58 = vmul.f32 -1.442695, %v326_v57 }
 0x662   :  { %1081 = vpow2.f32 %v918_v58 }
 0x66f   :  { %v1082_v59 = vpop.eup %1081 }
 0x670   :  { %v330_v60 = vadd.f32 1.0, %v1082_v59 }
 0x672   :  { %1083 = vrcp.f32 %v330_v60 }
 0x67f   :  { %v1084_v61 = vpop.eup %1083 }
 0x680   :  { %v333_v62 = vmul.f32 %v1084_v61, %v1208_v10 }
 0x682   :  { %v334_v63 = vadd.f32 %v333_v62, %v1212_v19 }
 0x684   :  { %337 = vrot.lane.b32.xlu1 %v334_v63, %s1120_s24  ;;  %v335_v7 = vmul.f32 %v334_v63, %v241_v48 }
 0x6f6   :  { %v338_v5 = vpop.permute.xlu1 %337 }
 0x6f7   :  { %v340_v6 = vmul.f32 %v338_v5, %v334_v63 }
 0x6f9   :  { %342 = vrot.lane.b32.xlu0 %v340_v6, %s1121_s25 }
 0x76b   :  { %v343_v8 = vpop.permute.xlu0 %342 }
 0x76c   :  { %v345_v9 = vadd.f32 %v343_v8, %v335_v7 }
 0x76e   :  { %1085 = vtanh.f32 %v345_v9 }
 0x77b   :  { %v1086_v11 = vpop.eup %1085 }
 0x77c   :  { %348 = vrot.lane.b32.xlu1 %v1086_v11, %s1120_s24 }
 0x7ee   :  { %v349_v12 = vpop.permute.xlu1 %348 }
 0x7ef   :  { %v351_v13 = vmul.f32 %v349_v12, %v334_v63 }
 0x7f1   :  { %355 = vrot.lane.b32.xlu0 %v351_v13, %s1121_s25  ;;  %v928_v13 = vld [vmem:[%s1360_s0 + $0x30] sm:$0xff] }
 0x863   :  { %v356_v14 = vpop.permute.xlu0 %355 }
 0x864   :  { %1017 = vmatmul.mubr.msk.f32.vlgmr.msra.gmra.mxu1 %vm22_vm0, %v356_v14 }
 0x865   :  { %1031 = vmatpush3.msra.mxu1 %v1152_v1  ;;  %1038 = vmatprep.mubr.msk.f32.mxu1 %vm1118_vm1, %v1117_v0 }
 0x866   :  { %1032 = vmatprep.subr.mxu1 %v1117_v0 }
 0x867   :  { %1033 = vmatpush3.msra.mxu1 %v1157_v2 }
 0x868   :  { %1034 = vmatprep.subr.mxu1 %v1117_v0 }
 0x869   :  { %1035 = vmatpush3.msra.mxu1 %v1171_v3 }
 0x86a   :  { %1036 = vmatprep.subr.mxu1 %v1117_v0 }
 0x86b   :  { %1037 = vmatpush3.msra.mxu1 %v1180_v4 }
 0x86c   :  { %1052 = vmatprep.subr.mxu1 %v1117_v0 }
 0x924   :  { %v425_v16 = vpop.f32.mrf.mxu1 }
 0x925   :  { %v429_v17 = vadd.f32 %v919_v15, %v425_v16 }
 0x926   :  { %v1018_v18 = vpop.f32.mrf.mxu1 }
 0x927   :  { %v430_v20 = vmul.f32 %v429_v17, %v1208_v10 }
 0x929   :  { %v921_v21 = vmul.f32 -1.442695, %v430_v20 }
 0x92b   :  { %1087 = vpow2.f32 %v921_v21 }
 0x938   :  { %v1088_v22 = vpop.eup %1087 }
 0x939   :  { %v434_v23 = vadd.f32 1.0, %v1088_v22 }
 0x93b   :  { %1089 = vrcp.f32 %v434_v23 }
 0x948   :  { %v1090_v24 = vpop.eup %1089 }
 0x949   :  { %v437_v25 = vmul.f32 %v1090_v24, %v1208_v10 }
 0x94b   :  { %v438_v26 = vadd.f32 %v437_v25, %v1212_v19 }
 0x94d   :  { %441 = vrot.lane.b32.xlu1 %v438_v26, %s1120_s24  ;;  %v439_v29 = vmul.f32 %v438_v26, %v345_v9 }
 0x9bf   :  { %v442_v27 = vpop.permute.xlu1 %441 }
 0x9c0   :  { %v444_v28 = vmul.f32 %v442_v27, %v438_v26 }
 0x9c2   :  { %446 = vrot.lane.b32.xlu0 %v444_v28, %s1121_s25 }
 0xa34   :  { %v447_v30 = vpop.permute.xlu0 %446 }
 0xa35   :  { %v449_v31 = vadd.f32 %v447_v30, %v439_v29 }
 0xa37   :  { %1091 = vtanh.f32 %v449_v31 }
 0xa44   :  { %v1092_v32 = vpop.eup %1091 }
 0xa45   :  { %452 = vrot.lane.b32.xlu1 %v1092_v32, %s1120_s24 }
 0xab7   :  { %v453_v33 = vpop.permute.xlu1 %452 }
 0xab8   :  { %v455_v34 = vmul.f32 %v453_v33, %v438_v26 }
 0xaba   :  { %459 = vrot.lane.b32.xlu0 %v455_v34, %s1121_s25  ;;  %v931_v34 = vld [vmem:[%s1360_s0 + $0x38] sm:$0xff] }
 0xb2c   :  { %v460_v35 = vpop.permute.xlu0 %459 }
 0xb2d   :  { %1028 = vmatmul.mubr.msk.f32.vlgmr.msra.gmra.mxu0 %vm22_vm0, %v460_v35 }
 0xb2e   :  { %1042 = vmatpush3.msra.mxu0 %v1152_v1  ;;  %1049 = vmatprep.mubr.msk.f32.mxu0 %vm1118_vm1, %v1117_v0 }
 0xb2f   :  { %1043 = vmatprep.subr.mxu0 %v1117_v0 }
 0xb30   :  { %1044 = vmatpush3.msra.mxu0 %v1157_v2 }
 0xb31   :  { %1045 = vmatprep.subr.mxu0 %v1117_v0 }
 0xb32   :  { %1046 = vmatpush3.msra.mxu0 %v1171_v3 }
 0xb33   :  { %1047 = vmatprep.subr.mxu0 %v1117_v0 }
 0xb34   :  { %1048 = vmatpush3.msra.mxu0 %v1180_v4 }
 0xbed   :  { %v529_v37 = vpop.f32.mrf.mxu0 }
 0xbee   :  { %v533_v38 = vadd.f32 %v922_v36, %v529_v37 }
 0xbef   :  { %v1029_v39 = vpop.f32.mrf.mxu0 }
 0xbf0   :  { %v534_v40 = vmul.f32 %v533_v38, %v1208_v10 }
 0xbf2   :  { %v924_v41 = vmul.f32 -1.442695, %v534_v40 }
 0xbf4   :  { %1093 = vpow2.f32 %v924_v41 }
 0xc01   :  { %v1094_v42 = vpop.eup %1093 }
 0xc02   :  { %v538_v43 = vadd.f32 1.0, %v1094_v42 }
 0xc04   :  { %1095 = vrcp.f32 %v538_v43 }
 0xc11   :  { %v1096_v44 = vpop.eup %1095 }
 0xc12   :  { %v541_v45 = vmul.f32 %v1096_v44, %v1208_v10 }
 0xc14   :  { %v542_v46 = vadd.f32 %v541_v45, %v1212_v19 }
 0xc16   :  { %545 = vrot.lane.b32.xlu1 %v542_v46, %s1120_s24  ;;  %v543_v49 = vmul.f32 %v542_v46, %v449_v31 }
 0xc88   :  { %v546_v47 = vpop.permute.xlu1 %545 }
 0xc89   :  { %v548_v48 = vmul.f32 %v546_v47, %v542_v46  ;;  %v934_v47 = vld [vmem:[%s1361_s2] ss:$0 sm:$0xff] }
 0xc8b   :  { %550 = vrot.lane.b32.xlu0 %v548_v48, %s1121_s25 }
 0xcfd   :  { %v551_v50 = vpop.permute.xlu0 %550 }
 0xcfe   :  { %v553_v51 = vadd.f32 %v551_v50, %v543_v49 }
 0xd00   :  { %1097 = vtanh.f32 %v553_v51 }
 0xd0d   :  { %v1098_v52 = vpop.eup %1097 }
 0xd0e   :  { %556 = vrot.lane.b32.xlu1 %v1098_v52, %s1120_s24 }
 0xd80   :  { %v557_v53 = vpop.permute.xlu1 %556 }
 0xd81   :  { %v559_v54 = vmul.f32 %v557_v53, %v542_v46 }
 0xd83   :  { %563 = vrot.lane.b32.xlu0 %v559_v54, %s1121_s25 }
 0xdf5   :  { %v564_v55 = vpop.permute.xlu0 %563 }
 0xdf6   :  { %1039 = vmatmul.mubr.msk.f32.vlgmr.msra.gmra.mxu1 %vm22_vm0, %v564_v55 }
 0xdf7   :  { %1053 = vmatpush3.msra.mxu1 %v1152_v1  ;;  %1060 = vmatprep.mubr.msk.f32.mxu1 %vm1118_vm1, %v1117_v0 }
 0xdf8   :  { %1054 = vmatprep.subr.mxu1 %v1117_v0 }
 0xdf9   :  { %1055 = vmatpush3.msra.mxu1 %v1157_v2 }
 0xdfa   :  { %1056 = vmatprep.subr.mxu1 %v1117_v0 }
 0xdfb   :  { %1057 = vmatpush3.msra.mxu1 %v1171_v3 }
 0xdfc   :  { %1058 = vmatprep.subr.mxu1 %v1117_v0 }
 0xdfd   :  { %1059 = vmatpush3.msra.mxu1 %v1180_v4 }
 0xeb6   :  { %v633_v1 = vpop.f32.mrf.mxu1 }
 0xeb7   :  { %v637_v57 = vadd.f32 %v925_v56, %v633_v1 }
 0xeb8   :  { %v1040_v58 = vpop.f32.mrf.mxu1 }
 0xeb9   :  { %v638_v59 = vmul.f32 %v637_v57, %v1208_v10  ;;  %v903_v57 = vstv %s1362_s3 }
 0xebb   :  { %v927_v60 = vmul.f32 -1.442695, %v638_v59 }
 0xebd   :  { %1099 = vpow2.f32 %v927_v60 }
 0xeca   :  { %v1100_v2 = vpop.eup %1099 }
 0xecb   :  { %v642_v61 = vadd.f32 1.0, %v1100_v2 }
 0xecd   :  { %1101 = vrcp.f32 %v642_v61 }
 0xeda   :  { %v1102_v62 = vpop.eup %1101 }
 0xedb   :  { %v645_v3 = vmul.f32 %v1102_v62, %v1208_v10 }
 0xedd   :  { %v646_v0 = vadd.f32 %v645_v3, %v1212_v19 }
 0xedf   :  { %649 = vrot.lane.b32.xlu1 %v646_v0, %s1120_s24  ;;  %v647_v5 = vmul.f32 %v646_v0, %v553_v51 }
 0xf51   :  { %v650_v4 = vpop.permute.xlu1 %649 }
 0xf52   :  { %v652_v63 = vmul.f32 %v650_v4, %v646_v0 }
 0xf54   :  { %654 = vrot.lane.b32.xlu0 %v652_v63, %s1121_s25 }
 0xfc6   :  { %v655_v6 = vpop.permute.xlu0 %654 }
 0xfc7   :  { %v657_v7 = vadd.f32 %v655_v6, %v647_v5 }
 0xfc9   :  { %1103 = vtanh.f32 %v657_v7 }
 0xfd6   :  { %v1104_v8 = vpop.eup %1103 }
 0xfd7   :  { %660 = vrot.lane.b32.xlu1 %v1104_v8, %s1120_s24 }
0x1049   :  { %v661_v9 = vpop.permute.xlu1 %660 }
0x104a   :  { %v663_v11 = vmul.f32 %v661_v9, %v646_v0 }
0x104c   :  { %667 = vrot.lane.b32.xlu0 %v663_v11, %s1121_s25 }
0x10be   :  { %v668_v12 = vpop.permute.xlu0 %667 }
0x10bf   :  { %1050 = vmatmul.mubr.msk.f32.vlgmr.msra.gmra.mxu0 %vm22_vm0, %v668_v12 }
0x117f   :  { %v737_v14 = vpop.f32.mrf.mxu0 }
0x1180   :  { %v741_v15 = vadd.f32 %v928_v13, %v737_v14 }
0x1181   :  { %v1051_v16 = vpop.f32.mrf.mxu0 }
0x1182   :  { %v742_v17 = vmul.f32 %v741_v15, %v1208_v10 }
0x1184   :  { %v930_v18 = vmul.f32 -1.442695, %v742_v17 }
0x1186   :  { %1105 = vpow2.f32 %v930_v18 }
0x1193   :  { %v1106_v20 = vpop.eup %1105 }
0x1194   :  { %v746_v21 = vadd.f32 1.0, %v1106_v20 }
0x1196   :  { %1107 = vrcp.f32 %v746_v21 }
0x11a3   :  { %v1108_v22 = vpop.eup %1107 }
0x11a4   :  { %v749_v23 = vmul.f32 %v1108_v22, %v1208_v10 }
0x11a6   :  { %v750_v24 = vadd.f32 %v749_v23, %v1212_v19 }
0x11a8   :  { %753 = vrot.lane.b32.xlu1 %v750_v24, %s1120_s24  ;;  %v751_v27 = vmul.f32 %v750_v24, %v657_v7 }
0x121a   :  { %v754_v25 = vpop.permute.xlu1 %753 }
0x121b   :  { %v756_v26 = vmul.f32 %v754_v25, %v750_v24 }
0x121d   :  { %758 = vrot.lane.b32.xlu0 %v756_v26, %s1121_s25 }
0x128f   :  { %v759_v28 = vpop.permute.xlu0 %758 }
0x1290   :  { %v761_v29 = vadd.f32 %v759_v28, %v751_v27 }
0x1292   :  { %1109 = vtanh.f32 %v761_v29 }
0x129f   :  { %v1110_v30 = vpop.eup %1109 }
0x12a0   :  { %764 = vrot.lane.b32.xlu1 %v1110_v30, %s1120_s24 }
0x1312   :  { %v765_v31 = vpop.permute.xlu1 %764 }
0x1313   :  { %v767_v32 = vmul.f32 %v765_v31, %v750_v24 }
0x1315   :  { %771 = vrot.lane.b32.xlu0 %v767_v32, %s1121_s25 }
0x1387   :  { %v772_v33 = vpop.permute.xlu0 %771 }
0x1388   :  { %1061 = vmatmul.mubr.msk.f32.vlgmr.msra.gmra.mxu1 %vm22_vm0, %v772_v33 }
0x1448   :  { %v841_v35 = vpop.f32.mrf.mxu1 }
0x1449   :  { %v845_v36 = vadd.f32 %v931_v34, %v841_v35 }
0x144a   :  { %v1062_v37 = vpop.f32.mrf.mxu1 }
0x144b   :  { %v846_v38 = vmul.f32 %v845_v36, %v1208_v10 }
0x144d   :  { %v933_v39 = vmul.f32 -1.442695, %v846_v38 }
0x144f   :  { %1111 = vpow2.f32 %v933_v39 }
0x145c   :  { %v1112_v40 = vpop.eup %1111 }
0x145d   :  { %v850_v41 = vadd.f32 1.0, %v1112_v40 }
0x145f   :  { %1113 = vrcp.f32 %v850_v41 }
0x146c   :  { %v1114_v42 = vpop.eup %1113 }
0x146d   :  { %v853_v43 = vmul.f32 %v1114_v42, %v1208_v10 }
0x146f   :  { %v854_v44 = vadd.f32 %v853_v43, %v1212_v19 }
0x1471   :  { %857 = vrot.lane.b32.xlu1 %v854_v44, %s1120_s24  ;;  %v855_v48 = vmul.f32 %v854_v44, %v761_v29 }
0x14e3   :  { %v858_v45 = vpop.permute.xlu1 %857 }
0x14e4   :  { %v860_v46 = vmul.f32 %v858_v45, %v854_v44 }
0x14e6   :  { %862 = vrot.lane.b32.xlu0 %v860_v46, %s1121_s25 }
0x14ea   :  { %891 = vrot.lane.b32.xlu0 %v934_v47, %s1122_s15 }
0x1558   :  { %v863_v49 = vpop.permute.xlu0 %862 }
0x1559   :  { %v865_v50 = vadd.f32 %v863_v49, %v855_v48 }
0x155b   :  { %1115 = vtanh.f32 %v865_v50 }
0x155c   :  { %v892_v19 = vpop.permute.xlu0 %891 }
0x1568   :  { %v1116_v51 = vpop.eup %1115 }
0x1569   :  { %868 = vrot.lane.b32.xlu1 %v1116_v51, %s1120_s24 }
0x15db   :  { %v869_v10 = vpop.permute.xlu1 %868 }
0x15dc   :  { %v871_v52 = vmul.f32 %v869_v10, %v854_v44 }
0x15de   :  { %v894_v53 = vmul.f32 %v892_v19, %v871_v52 }
0x15e0   :  { %896 = vrot.lane.b32.xlu1 %v894_v53, %s1121_s25 }
0x15e4   :  { %873 = vrot.lane.b32.xlu1 %v871_v52, %s1121_s25 }
0x15e8   :  { %878 = vrot.lane.b32.xlu1 %v865_v50, %s1122_s15 }
0x1652   :  { %v897_v54 = vpop.permute.xlu1 %896 }
0x1653   :  { %v899_v55 = vsel %vm22_vm0, %v897_v54, 0.0 }
0x1654   :  { %900 = vadd.xlane.f32.xlu0 %v899_v55 }
0x1656   :  { %v874_v56 = vpop.permute.xlu1 %873 }
0x1657   :  { %876 = vst.msk [vmem:[#allocation2] sm:$0xff] %vm22_vm0, %v874_v56 }
0x165a   :  { %v879_v1 = vpop.permute.xlu1 %878 }
0x165b   :  { %881 = vst.msk [vmem:[#allocation3] sm:$0xff] %vm22_vm0, %v879_v1 }
0x16dd   :  { %v901_v58 = vpop.xlane.xlu0 %900 }
0x16de   :  { %v904_v59 = vadd.f32 %v903_v57, %v901_v58 }
0x16e0   :  { %906 = vst.msk [vmem:[%s1363_s4] sm:$0xff] %vm905_vm5, %v904_v59 }

</bundles_post_ra>
